<compile_context>
chip_gen: v7x
topology: tpu7x:2x2x1
jax: 0.10.0
libtpu: 0.0.40
codegen_flags: <defaults>
</compile_context>

<pallas_src>
import functools

import jax
import jax.numpy as jnp
from jax import lax
from jax.experimental import pallas as pl
from jax.experimental.pallas import tpu as pltpu


OUT_W = 128  # lane-dense output width; distances occupy lanes [0, 2B)


# ----------------------------- Pallas kernel --------------------------------

def _triplet_kernel(a_ref, p_ref, n_ref, w1_ref, b1_ref, w2_ref, o_ref,
                    *, batch, m_pad):
    """Fused feature extraction (stacked a/p/n batch) + triplet L2 distances.

    a/p/n: (B, D_in) f32 flattened images
    w1:    (D_in, HID) bf16    b1: (1, HID) f32    w2: (HID, EMB) bf16
    o:     (1, OUT_W) f32 ; lanes [0:B) = p_dist, [B:2B) = n_dist, rest 0.
    """
    d_in = a_ref.shape[1]
    emb = w2_ref.shape[1]

    # Assemble the stacked [anchor; pos; neg; zero-pad] tile in registers —
    # no wrapper-side concat/pad HBM materialization.  m_pad is a multiple of
    # 16, so the bf16 matmul M dimension is sublane-tile aligned.
    pad = jnp.zeros((m_pad - 3 * batch, d_in), jnp.float32)
    x = jnp.concatenate([a_ref[...], p_ref[...], n_ref[...], pad], axis=0)
    x = x.astype(jnp.bfloat16)                              # (m_pad, D_in)

    # 2-layer MLP feature extractor: bf16 MXU inputs, f32 accumulation, and all
    # post-matmul elementwise math in f32 (v5e VPU/EUP have no bf16 support).
    h = jnp.dot(x, w1_ref[...], preferred_element_type=jnp.float32)
    h = jnp.maximum(h + b1_ref[...], 0.0)                   # (m_pad, HID) f32
    feats = jnp.dot(h.astype(jnp.bfloat16), w2_ref[...],
                    preferred_element_type=jnp.float32)     # (m_pad, EMB) f32
    # b2 intentionally omitted: it cancels exactly in (a - p) and (a - n).

    fa = feats[0:batch]                                     # (B, EMB)
    fp = feats[batch:2 * batch]                              # (B, EMB)
    fn = feats[2 * batch:3 * batch]                          # (B, EMB)

    # Diff stack zero-padded to OUT_W rows so the reduction below lands
    # directly in a lane-dense (1, OUT_W) row (unmasked output store).
    zrows = jnp.zeros((o_ref.shape[1] - 2 * batch, emb), jnp.float32)
    diffs = jnp.concatenate([fa - fp, fa - fn, zrows], axis=0)   # (OUT_W, EMB)
    sq = diffs * diffs

    # Per-row squared L2 via a single MXU contraction (ones-vector dot) instead
    # of an XLU cross-lane reduce + diagonal extraction.
    ones_row = jnp.ones((1, emb), jnp.float32)
    dist_sq = lax.dot_general(ones_row, sq, (((1,), (1,)), ((), ())),
                              preferred_element_type=jnp.float32)  # (1, OUT_W)

    # Forward-only; a VJP would need a safe-sqrt epsilon at dist == 0.
    o_ref[...] = jnp.sqrt(dist_sq).astype(o_ref.dtype)


# ------------------------------ JAX wrapper ----------------------------------

_VMEM_SPEC = pl.BlockSpec(memory_space=pltpu.MemorySpace.VMEM)


def triplet_net_forward(anchor, pos, neg, params):
    """Mirrors TripletNet.forward: returns (p_dist, n_dist), each shape (B,)."""
    w1, b1, w2 = params
    B = anchor.shape[0]
    d_in, hid = w1.shape
    emb = w2.shape[1]
    assert 2 * B <= OUT_W, "grow OUT_W (multiple of 128) for larger batches"

    # Flatten NCHW images (contiguous reshape — no extra HBM roundtrip).
    a2 = anchor.reshape(B, -1).astype(jnp.float32)
    p2 = pos.reshape(B, -1).astype(jnp.float32)
    n2 = neg.reshape(B, -1).astype(jnp.float32)

    # Stacked batch rows, padded to a bf16 sublane tile (multiple of 16).
    m_pad = ((3 * B + 15) // 16) * 16

    cost = pl.CostEstimate(
        flops=(2 * m_pad * d_in * hid          # layer 1
               + 2 * m_pad * hid * emb          # layer 2
               + 2 * OUT_W * emb                # distance contraction
               + 6 * OUT_W * emb),              # elementwise epilogue
        transcendentals=OUT_W,
        bytes_accessed=(2 * (d_in * hid + hid * emb)       # bf16 weights
                        + 4 * (3 * B * d_in + hid + OUT_W)),
    )

    # Single fused grid-less pallas_call: all operands VMEM-resident, weights
    # DMA'd once.  (Scaling D_in/HID needs a K-tiled grid; see header.)
    out = pl.pallas_call(
        functools.partial(_triplet_kernel, batch=B, m_pad=m_pad),
        out_shape=jax.ShapeDtypeStruct((1, OUT_W), jnp.float32),
        in_specs=[_VMEM_SPEC] * 6,
        out_specs=_VMEM_SPEC,
        cost_estimate=cost,
    )(a2, p2, n2, w1, b1, w2)

    p_dist = out[0, :B]
    n_dist = out[0, B:2 * B]
    return p_dist, n_dist


# --------------------------------- main ---------------------------------------

if __name__ == "__main__":
    key = jax.random.PRNGKey(0)
    k_a, k_p, k_n, k_w1, k_b1, k_w2 = jax.random.split(key, 6)

    # Small shapes consistent with an image triplet: B=2, C=4, H=W=16
    B, C, H, W = 2, 4, 16, 16
    D_in = C * H * W          # 1024
    HID = 128                 # hidden width (lane-aligned)
    EMB = 128                 # embedding dim (lane-aligned)

    anchor = jax.random.normal(k_a, (B, C, H, W), dtype=jnp.float32)
    pos = jax.random.normal(k_p, (B, C, H, W), dtype=jnp.float32)
    neg = jax.random.normal(k_n, (B, C, H, W), dtype=jnp.float32)

    # Deterministic parameter init (Kaiming-like scaling); weights in bf16.
    w1 = (jax.random.normal(k_w1, (D_in, HID), dtype=jnp.float32)
          * (2.0 / D_in) ** 0.5).astype(jnp.bfloat16)
    b1 = (jax.random.normal(k_b1, (1, HID), dtype=jnp.float32) * 0.01)
    w2 = (jax.random.normal(k_w2, (HID, EMB), dtype=jnp.float32)
          * (2.0 / HID) ** 0.5).astype(jnp.bfloat16)
    params = (w1, b1, w2)

    p_dist, n_dist = jax.jit(triplet_net_forward)(anchor, pos, neg, params)
    jax.block_until_ready((p_dist, n_dist))

    # Pure-JAX reference mimicking the kernel's bf16 matmul inputs / f32 acc.
    def ref_feat(img):
        x = img.reshape(B, -1).astype(jnp.bfloat16)
        h = jnp.maximum(
            jnp.dot(x, w1, preferred_element_type=jnp.float32) + b1, 0.0)
        return jnp.dot(h.astype(jnp.bfloat16), w2,
                       preferred_element_type=jnp.float32)

    def ref_dist(i1, i2):
        d = ref_feat(i1) - ref_feat(i2)
        return jnp.sqrt(jnp.sum(d * d, axis=-1))

    assert p_dist.shape == (B,) and n_dist.shape == (B,)
    assert jnp.allclose(p_dist, ref_dist(anchor, pos), rtol=2e-2, atol=2e-2)
    assert jnp.allclose(n_dist, ref_dist(anchor, neg), rtol=2e-2, atol=2e-2)

    print("KERNEL_OK")
</pallas_src>

<mosaic_0001>
module attributes {stable_mosaic.version = 11 : i64} {
  func.func @_triplet_kernel(%arg0: memref<2x1024xf32, #tpu.memory_space<vmem>>, %arg1: memref<2x1024xf32, #tpu.memory_space<vmem>>, %arg2: memref<2x1024xf32, #tpu.memory_space<vmem>>, %arg3: memref<1024x128xbf16, #tpu.memory_space<vmem>>, %arg4: memref<1x128xf32, #tpu.memory_space<vmem>>, %arg5: memref<128x128xbf16, #tpu.memory_space<vmem>>, %arg6: memref<1x128xf32, #tpu.memory_space<vmem>>) attributes {dimension_semantics = [], scalar_prefetch = 0 : i64, scratch_operands = 0 : i64, tpu.core_type = #tpu.core_type<tc>} {
    %cst = arith.constant 0.000000e+00 : f32
    %0 = vector.broadcast %cst : f32 to vector<10x1024xf32>
    %c0 = arith.constant 0 : index
    %c0_0 = arith.constant 0 : index
    %1 = vector.load %arg0[%c0, %c0_0] : memref<2x1024xf32, #tpu.memory_space<vmem>>, vector<2x1024xf32>
    %c0_1 = arith.constant 0 : index
    %c0_2 = arith.constant 0 : index
    %2 = vector.load %arg1[%c0_1, %c0_2] : memref<2x1024xf32, #tpu.memory_space<vmem>>, vector<2x1024xf32>
    %c0_3 = arith.constant 0 : index
    %c0_4 = arith.constant 0 : index
    %3 = vector.load %arg2[%c0_3, %c0_4] : memref<2x1024xf32, #tpu.memory_space<vmem>>, vector<2x1024xf32>
    %4 = tpu.concatenate %1, %2, %3, %0 in 0 : vector<2x1024xf32>, vector<2x1024xf32>, vector<2x1024xf32>, vector<10x1024xf32> -> vector<16x1024xf32>
    %5 = arith.truncf %4 : vector<16x1024xf32> to vector<16x1024xbf16>
    %c0_5 = arith.constant 0 : index
    %c0_6 = arith.constant 0 : index
    %6 = vector.load %arg3[%c0_5, %c0_6] : memref<1024x128xbf16, #tpu.memory_space<vmem>>, vector<1024x128xbf16>
    %cst_7 = arith.constant dense<0.000000e+00> : vector<16x128xf32>
    %7 = tpu.matmul %5, %6, %cst_7 {dimension_numbers = #tpu.dot_dimension_numbers<[1], [0], [0], [1], [0, 0, 1, 1], [], []>} : vector<16x1024xbf16>, vector<1024x128xbf16>, vector<16x128xf32> -> vector<16x128xf32>
    %c0_8 = arith.constant 0 : index
    %c0_9 = arith.constant 0 : index
    %8 = vector.load %arg4[%c0_8, %c0_9] : memref<1x128xf32, #tpu.memory_space<vmem>>, vector<1x128xf32>
    %9 = vector.broadcast %8 : vector<1x128xf32> to vector<16x128xf32>
    %10 = arith.addf %7, %9 : vector<16x128xf32>
    %cst_10 = arith.constant 0.000000e+00 : f32
    %11 = vector.broadcast %cst_10 : f32 to vector<16x128xf32>
    %12 = arith.maximumf %10, %11 : vector<16x128xf32>
    %13 = arith.truncf %12 : vector<16x128xf32> to vector<16x128xbf16>
    %c0_11 = arith.constant 0 : index
    %c0_12 = arith.constant 0 : index
    %14 = vector.load %arg5[%c0_11, %c0_12] : memref<128x128xbf16, #tpu.memory_space<vmem>>, vector<128x128xbf16>
    %cst_13 = arith.constant dense<0.000000e+00> : vector<16x128xf32>
    %15 = tpu.matmul %13, %14, %cst_13 {dimension_numbers = #tpu.dot_dimension_numbers<[1], [0], [0], [1], [0, 0, 1, 1], [], []>} : vector<16x128xbf16>, vector<128x128xbf16>, vector<16x128xf32> -> vector<16x128xf32>
    %16 = vector.extract_strided_slice %15 {offsets = [0, 0], sizes = [2, 128], strides = [1, 1]} : vector<16x128xf32> to vector<2x128xf32>
    %17 = vector.extract_strided_slice %15 {offsets = [2, 0], sizes = [2, 128], strides = [1, 1]} : vector<16x128xf32> to vector<2x128xf32>
    %18 = vector.extract_strided_slice %15 {offsets = [4, 0], sizes = [2, 128], strides = [1, 1]} : vector<16x128xf32> to vector<2x128xf32>
    %cst_14 = arith.constant 0.000000e+00 : f32
    %19 = vector.broadcast %cst_14 : f32 to vector<124x128xf32>
    %20 = arith.subf %16, %17 : vector<2x128xf32>
    %21 = arith.subf %16, %18 : vector<2x128xf32>
    %22 = tpu.concatenate %20, %21, %19 in 0 : vector<2x128xf32>, vector<2x128xf32>, vector<124x128xf32> -> vector<128x128xf32>
    %23 = arith.mulf %22, %22 : vector<128x128xf32>
    %cst_15 = arith.constant 1.000000e+00 : f32
    %24 = vector.broadcast %cst_15 : f32 to vector<1x128xf32>
    %cst_16 = arith.constant dense<0.000000e+00> : vector<1x128xf32>
    %25 = tpu.matmul %24, %23, %cst_16 {dimension_numbers = #tpu.dot_dimension_numbers<[1], [1], [0], [0], [0, 0, 1, 0], [], []>} : vector<1x128xf32>, vector<128x128xf32>, vector<1x128xf32> -> vector<1x128xf32>
    %26 = math.sqrt %25 : vector<1x128xf32>
    %c0_17 = arith.constant 0 : index
    %c0_18 = arith.constant 0 : index
    %27 = vector.load %arg6[%c0_17, %c0_18] : memref<1x128xf32, #tpu.memory_space<vmem>>, vector<1x128xf32>
    tpu.vector_store %arg6[%c0_17, %c0_18], %26 {strides = array<i32>} : memref<1x128xf32, #tpu.memory_space<vmem>>, vector<1x128xf32>,
    return
  }
}

</mosaic_0001>

<bundles_post_ra>
// kernel: triplet_net_forward.1
= control target key start
LH: loop header
LB: loop body
LE: loop exit
PB: predicated region body
PF: predicated region fallthrough
CT: control target
= control target key end

     0   :  { %11 = vsyncpa [#allocation3], 0  ;;  %s1430_s21 = smov [#allocation2]   ;;  %s1605_s0 = inlined_call_operand.vmem [shape: f32[2,1024], index: 0, kind: input, shape index: {}]   ;;  %s1606_s1 = inlined_call_operand.vmem [shape: f32[2,1024], index: 1, kind: input, shape index: {}]   ;;  %s1607_s2 = inlined_call_operand.vmem [shape: f32[2,1024], index: 2, kind: input, shape index: {}]   ;;  %s1608_s3 = inlined_call_operand.hbm [shape: bf16[1024,128], index: 3, kind: input, shape index: {}]   ;;  %s1609_s4 = inlined_call_operand.vmem [shape: f32[1,128], index: 4, kind: input, shape index: {}]   ;;  %s1610_s5 = inlined_call_operand.vmem [shape: bf16[128,128], index: 5, kind: input, shape index: {}]   ;;  %s1611_s6 = inlined_call_operand.vmem [shape: f32[1,128], index: 6, kind: output, shape index: {}]  }
   0x1   :  { %s23_s22 = sshll.u32 %s1430_s21, 4  ;;  %s1406_s25 = scalar_lea.hbm %s1608_s3, 8192  ;;  %s24_s22 = int_to_ptr.vmem [resolvable:$true] %s23_s22 }
   0x2   :  { %p1407_p0 = scmp.ne.s32.totalorder %s1608_s3, %s1406_s25  ;;  %p1410_p1 = scmp.lt.u32.totalorder %s1406_s25, %s1608_s3 }
   0x4   :  { %p1412_p2 = pnand %p1410_p1, %p1407_p0 }
   0x6   :  { %1415 = shalt.err (!%p1412_p2)
}
   0x7   :  { %s1416_s30 = scalar_lea.vmem %s24_s22, 8192  ;;  %p1421_p4 = scmp.lt.s32.totalorder %s24_s22, %s24_s22 }
   0x8   :  { %p1417_p3 = scmp.ne.s32.totalorder %s24_s22, %s1416_s30  ;;  %p1422_p5 = scmp.lt.s32.totalorder %s1416_s30, %s1416_s30 }
   0xa   :  { %p1423_p6 = por %p1422_p5, %p1421_p4 }
   0xc   :  { %p1424_p7 = pnand %p1423_p6, %p1417_p3 }
   0xe   :  { %1427 = shalt.err (!%p1424_p7)
}
   0xf   :  { %s1431_s7 = smov 64   ;;  %s1432_s8 = smov 4  }
  0x10   :  { %29 = dma.hbm_to_vmem [thread:$0]  %s1608_s3, 8192, %s24_s22, [#allocation3], %s1431_s7, %s1431_s7, %s1432_s8  }
  0x11   :  { %1428 = dma.done.wait [#allocation3], 8192  }
  0x12   :  { %1429 = vsyncadd [#allocation3], 4294959104  ;;  %v1326_v0 = vld [vmem:[#allocation2 + $0x40] sm:$0xff]   ;;  %v1330_v4 = vld [vmem:[#allocation2 + $0x48] sm:$0xff]   ;;  %v1433_v22 = vmov 1983009808   ;;  %v50_v24 = vlaneseq }
  0x13   :  { %v1327_v1 = vld [vmem:[#allocation2 + $0xc0] sm:$0xff]   ;;  %1194 = vmatprep.subr.bf16.mxu0 %v1326_v0  ;;  %v1331_v5 = vld [vmem:[#allocation2 + $0xc8] sm:$0xff]   ;;  %v1334_v8 = vld [vmem:[#allocation2 + $0x50] sm:$0xff]   ;;  %v48_v23 = vunpack.c.l.s4 %v1433_v22  ;;  %vm176_vm0 = vcmask 1041408   ;;  %vm185_vm1 = vcmask 1043456   ;;  %vm194_vm2 = vcmask 1045504  }
  0x14   :  { %v1328_v2 = vld [vmem:[#allocation2] sm:$0xff]   ;;  %1216 = vmatprep.subr.bf16.mxu1 %v1327_v1  ;;  %v1332_v6 = vld [vmem:[#allocation2 + $0x8] sm:$0xff]   ;;  %v1335_v9 = vld [vmem:[#allocation2 + $0xd0] sm:$0xff]   ;;  %v51_v30 = vshrl.u32 %v50_v24, 7  ;;  %vm1434_vm3 = vmmov 1   ;;  %vm1436_vm5 = vmmov 0  }
  0x15   :  { %v1329_v3 = vld [vmem:[#allocation2 + $0x80] sm:$0xff]   ;;  %1195 = vmatpush3.bf16.msra.mxu0 %v1328_v2  ;;  %v1333_v7 = vld [vmem:[#allocation2 + $0x88] sm:$0xff]   ;;  %v1336_v10 = vld [vmem:[#allocation2 + $0x10] sm:$0xff]   ;;  %v49_v29 = vunpack.c.0.s8 %v48_v23 }
  0x16   :  { %1217 = vmatpush3.bf16.msra.mxu1 %v1329_v3  ;;  %1196 = vmatprep.subr.bf16.mxu0 %v1330_v4  ;;  %v1337_v11 = vld [vmem:[#allocation2 + $0x90] sm:$0xff]   ;;  %v1338_v12 = vld [vmem:[#allocation2 + $0x58] sm:$0xff]   ;;  %v1342_v16 = vld [vmem:[#allocation2 + $0x60] sm:$0xff]   ;;  %v1435_v3 = vmov 0.0  }
  0x17   :  { %1218 = vmatprep.subr.bf16.mxu1 %v1331_v5  ;;  %v1339_v13 = vld [vmem:[#allocation2 + $0xd8] sm:$0xff]   ;;  %v1343_v17 = vld [vmem:[#allocation2 + $0xe0] sm:$0xff]   ;;  %v1346_v20 = vld [vmem:[#allocation2 + $0x68] sm:$0xff]   ;;  %v1485_v35 = vsub.s32 %v49_v29, %v51_v30 }
  0x18   :  { %v1340_v14 = vld [vmem:[#allocation2 + $0x18] sm:$0xff]   ;;  %v1344_v18 = vld [vmem:[#allocation2 + $0x20] sm:$0xff]   ;;  %v1347_v21 = vld [vmem:[#allocation2 + $0xe8] sm:$0xff]  }
  0x19   :  { %1197 = vmatpush3.bf16.msra.mxu0 %v1332_v6  ;;  %v1341_v15 = vld [vmem:[#allocation2 + $0x98] sm:$0xff]   ;;  %v1345_v19 = vld [vmem:[#allocation2 + $0xa0] sm:$0xff]   ;;  %v1348_v25 = vld [vmem:[#allocation2 + $0x28] sm:$0xff]  }
  0x1a   :  { %1219 = vmatpush3.bf16.msra.mxu1 %v1333_v7  ;;  %1198 = vmatprep.subr.bf16.mxu0 %v1334_v8  ;;  %v1349_v26 = vld [vmem:[#allocation2 + $0xa8] sm:$0xff]   ;;  %v1350_v27 = vld [vmem:[#allocation2 + $0x70] sm:$0xff]   ;;  %v1354_v33 = vld [vmem:[#allocation2 + $0x78] sm:$0xff]  }
  0x1b   :  { %1220 = vmatprep.subr.bf16.mxu1 %v1335_v9  ;;  %v1351_v28 = vld [vmem:[#allocation2 + $0xf0] sm:$0xff]   ;;  %v1355_v34 = vld [vmem:[#allocation2 + $0xf8] sm:$0xff]   ;;  %v38_v38 = vld [vmem:[%s1605_s0] sm:$0xff] }
  0x1c   :  { %v1352_v31 = vld [vmem:[#allocation2 + $0x30] sm:$0xff]   ;;  %v1356_v36 = vld [vmem:[#allocation2 + $0x38] sm:$0xff]   ;;  %v40_v39 = vld [vmem:[%s1606_s1] sm:$0xff]  ;;  %v53_v41 = vrot.slane %v38_v38, %v1485_v35  ;;  %v46_v44 = vcombine.high %v38_v38, %v38_v38 }
  0x1d   :  { %1199 = vmatpush3.bf16.msra.mxu0 %v1336_v10  ;;  %v1353_v32 = vld [vmem:[#allocation2 + $0xb0] sm:$0xff]   ;;  %v1357_v37 = vld [vmem:[#allocation2 + $0xb8] sm:$0xff]   ;;  %v42_v40 = vld [vmem:[%s1607_s2] sm:$0xff]  ;;  %v90_v42 = vcombine.low %v40_v39, %v40_v39  ;;  %v104_v46 = vrot.slane %v40_v39, %v1485_v35 }
  0x1e   :  { %1221 = vmatpush3.bf16.msra.mxu1 %v1337_v11  ;;  %1200 = vmatprep.subr.bf16.mxu0 %v1338_v12  ;;  %v141_v43 = vrot.slane %v42_v40, %v1485_v35  ;;  %v1361_v45 = vld [vmem:[#allocation2 + $0x140] sm:$0xff]   ;;  %v134_v47 = vcombine.high %v42_v40, %v42_v40  ;;  %v61_v49 = vcombine.high %v53_v41, %v53_v41  ;;  %vm1505_vm4 = vmpackc.low %vm1434_vm3, %vm194_vm2  ;;  %v1365_v10 = vld [vmem:[#allocation2 + $0x148] sm:$0xff]  }
  0x1f   :  { %1222 = vmatprep.subr.bf16.mxu1 %v1339_v13  ;;  %v1362_v48 = vld [vmem:[#allocation2 + $0x1c0] sm:$0xff]   ;;  %v97_v50 = vrot.slane %v90_v42, %v1485_v35  ;;  %v60_v52 = vrot.slane %v46_v44, %v1485_v35  ;;  %v106_v53 = vcombine.high %v104_v46, %v104_v46  ;;  %v1366_v11 = vld [vmem:[#allocation2 + $0x1c8] sm:$0xff]   ;;  %v1385_v30 = vld [vmem:[#allocation2 + $0x170] sm:$0xff]  }
  0x20   :  { %v149_v51 = vcombine.low %v141_v43, %v141_v43  ;;  %v148_v54 = vrot.slane %v134_v47, %v1485_v35  ;;  %v1363_v0 = vld [vmem:[#allocation2 + $0x100] sm:$0xff]   ;;  %v1367_v12 = vld [vmem:[#allocation2 + $0x108] sm:$0xff]   ;;  %v1392_v44 = vld [vmem:[#allocation2 + $0x1b8] sm:$0xff]  }
  0x21   :  { %1201 = vmatpush3.bf16.msra.mxu0 %v1340_v14  ;;  %v105_v55 = vcombine.high %v97_v50, %v97_v50  ;;  %v62_v56 = vcombine.high %v60_v52, %v60_v52  ;;  %v177_v57 = vsel %vm176_vm0, %v53_v41, %v97_v50  ;;  %v179_v58 = vsel %vm176_vm0, %v60_v52, %v104_v46  ;;  %v1364_v6 = vld [vmem:[#allocation2 + $0x180] sm:$0xff]   ;;  %v1368_v13 = vld [vmem:[#allocation2 + $0x188] sm:$0xff]   ;;  %v1369_v14 = vld [vmem:[#allocation2 + $0x150] sm:$0xff]  }
  0x22   :  { %1223 = vmatpush3.bf16.msra.mxu1 %v1341_v15  ;;  %1202 = vmatprep.subr.bf16.mxu0 %v1342_v16  ;;  %v150_v60 = vcombine.low %v148_v54, %v148_v54  ;;  %v186_v61 = vsel %vm185_vm1, %v177_v57, %v149_v51  ;;  %v1370_v15 = vld [vmem:[#allocation2 + $0x1d0] sm:$0xff]   ;;  %v1377_v22 = vld [vmem:[#allocation2 + $0x160] sm:$0xff]   ;;  %v1384_v29 = vld [vmem:[#allocation2 + $0x1a8] sm:$0xff]  }
  0x23   :  { %1224 = vmatprep.subr.bf16.mxu1 %v1343_v17  ;;  %v178_v62 = vsel %vm176_vm0, %v61_v49, %v105_v55  ;;  %v180_v63 = vsel %vm176_vm0, %v62_v56, %v106_v53  ;;  %v1166_v4 = vpack.c.bf16 %v1435_v3, %v186_v61  ;;  %v1371_v16 = vld [vmem:[#allocation2 + $0x110] sm:$0xff]   ;;  %v1378_v23 = vld [vmem:[#allocation2 + $0x1e0] sm:$0xff]   ;;  %v41_v38 = vld [vmem:[%s1606_s1 + $0x8] sm:$0xff] }
  0x24   :  { %v187_v1 = vsel %vm185_vm1, %v178_v62, %v141_v43  ;;  %v189_v2 = vsel %vm185_vm1, %v180_v63, %v148_v54  ;;  %v188_v5 = vsel %vm185_vm1, %v179_v58, %v150_v60  ;;  %v1372_v17 = vld [vmem:[#allocation2 + $0x190] sm:$0xff]   ;;  %v1379_v24 = vld [vmem:[#allocation2 + $0x120] sm:$0xff]   ;;  %v43_v39 = vld [vmem:[%s1607_s2 + $0x8] sm:$0xff]  ;;  %v107_v41 = vcombine.low %v41_v38, %v41_v38 }
  0x25   :  { %1203 = vmatpush3.bf16.msra.mxu0 %v1344_v18  ;;  %v1163_v7 = vpack.c.bf16 %v1435_v3, %v187_v1  ;;  %v1169_v8 = vpack.c.bf16 %v1435_v3, %v189_v2  ;;  %v1172_v9 = vpack.c.bf16 %v1435_v3, %v188_v5  ;;  %v1373_v18 = vld [vmem:[#allocation2 + $0x158] sm:$0xff]   ;;  %v158_v42 = vrot.slane %v43_v39, %v1485_v35 }
  0x26   :  { %1225 = vmatpush3.bf16.msra.mxu1 %v1345_v19  ;;  %1204 = vmatprep.subr.bf16.mxu0 %v1346_v20  ;;  %v1374_v19 = vld [vmem:[#allocation2 + $0x1d8] sm:$0xff]   ;;  %v121_v46 = vrot.slane %v41_v38, %v1485_v35  ;;  %v151_v47 = vcombine.high %v43_v39, %v43_v39  ;;  %v114_v49 = vrot.slane %v107_v41, %v1485_v35 }
  0x27   :  { %1226 = vmatprep.subr.bf16.mxu1 %v1347_v21  ;;  %1164 = vmatprep.mubr.msk.bf16.mxu0 %vm1505_vm4, %v1163_v7  ;;  %v1375_v20 = vld [vmem:[#allocation2 + $0x118] sm:$0xff]   ;;  %v166_v50 = vcombine.low %v158_v42, %v158_v42  ;;  %v1397_v7 = vld [vmem:[%s1610_s5 + $0x8] sm:$0xff]  }
  0x28   :  { %1170 = vmatprep.mubr.msk.bf16.mxu1 %vm1505_vm4, %v1169_v8  ;;  %v1376_v21 = vld [vmem:[#allocation2 + $0x198] sm:$0xff]   ;;  %v123_v52 = vcombine.high %v121_v46, %v121_v46  ;;  %v165_v53 = vrot.slane %v151_v47, %v1485_v35  ;;  %v122_v54 = vcombine.high %v114_v49, %v114_v49  ;;  %v1398_v8 = vld [vmem:[%s1610_s5 + $0x10] sm:$0xff]  }
  0x29   :  { %1205 = vmatpush3.bf16.msra.mxu0 %v1348_v25  ;;  %v1380_v25 = vld [vmem:[#allocation2 + $0x1a0] sm:$0xff]   ;;  %v1391_v43 = vld [vmem:[#allocation2 + $0x138] sm:$0xff]  }
  0x2a   :  { %1227 = vmatpush3.bf16.msra.mxu1 %v1349_v26  ;;  %1206 = vmatprep.subr.bf16.mxu0 %v1350_v27  ;;  %v1381_v26 = vld [vmem:[#allocation2 + $0x168] sm:$0xff]   ;;  %v167_v57 = vcombine.low %v165_v53, %v165_v53  ;;  %v1399_v59 = vld [vmem:[%s1610_s5 + $0x18] sm:$0xff]  }
  0x2b   :  { %1228 = vmatprep.subr.bf16.mxu1 %v1351_v28  ;;  %v1382_v27 = vld [vmem:[#allocation2 + $0x1e8] sm:$0xff]  }
  0x2c   :  { %v1383_v28 = vld [vmem:[#allocation2 + $0x128] sm:$0xff]  }
  0x2d   :  { %1207 = vmatpush3.bf16.msra.mxu0 %v1352_v31  ;;  %v1386_v31 = vld [vmem:[#allocation2 + $0x1f0] sm:$0xff]  }
  0x2e   :  { %1229 = vmatpush3.bf16.msra.mxu1 %v1353_v32  ;;  %1208 = vmatprep.subr.bf16.mxu0 %v1354_v33  ;;  %v1387_v32 = vld [vmem:[#allocation2 + $0x130] sm:$0xff]  }
  0x2f   :  { %1230 = vmatprep.subr.bf16.mxu1 %v1355_v34  ;;  %v1388_v33 = vld [vmem:[#allocation2 + $0x1b0] sm:$0xff]   ;;  %v1389_v34 = vld [vmem:[#allocation2 + $0x178] sm:$0xff]  }
  0x31   :  { %1209 = vmatpush3.bf16.msra.mxu0 %v1356_v36  ;;  %v1390_v36 = vld [vmem:[#allocation2 + $0x1f8] sm:$0xff]  }
  0x32   :  { %1231 = vmatpush3.bf16.msra.mxu1 %v1357_v37  ;;  %1238 = vmatprep.subr.bf16.mxu0 %v1361_v45  ;;  %v39_v37 = vld [vmem:[%s1605_s0 + $0x8] sm:$0xff] }
  0x33   :  { %1260 = vmatprep.subr.bf16.mxu1 %v1362_v48  ;;  %v70_v40 = vrot.slane %v39_v37, %v1485_v35  ;;  %v63_v45 = vcombine.high %v39_v37, %v39_v37 }
  0x34   :  { %1167 = vmatmul.mubr.msk.bf16.vlgmr.msra.gmra.mrb[0].mxu0 %vm1505_vm4, %v1166_v4 }
  0x35   :  { %1173 = vmatmul.mubr.msk.bf16.vlgmr.msra.gmra.mrb[0].mxu1 %vm1505_vm4, %v1172_v9  ;;  %1239 = vmatpush3.bf16.msra.mxu0 %v1363_v0  ;;  %v78_v48 = vcombine.high %v70_v40, %v70_v40  ;;  %v77_v51 = vrot.slane %v63_v45, %v1485_v35  ;;  %v181_v55 = vsel %vm176_vm0, %v70_v40, %v114_v49  ;;  %v1400_v9 = vld [vmem:[%s1610_s5 + $0x20] sm:$0xff]  }
  0x36   :  { %1261 = vmatpush3.bf16.msra.mxu1 %v1364_v6  ;;  %1240 = vmatprep.subr.bf16.mxu0 %v1365_v10  ;;  %v190_v58 = vsel %vm185_vm1, %v181_v55, %v166_v50  ;;  %v1396_v6 = vld [vmem:[%s1610_s5] sm:$0xff]   ;;  %v1401_v10 = vld [vmem:[%s1610_s5 + $0x28] sm:$0xff]  }
  0x37   :  { %1262 = vmatprep.subr.bf16.mxu1 %v1366_v11  ;;  %v79_v56 = vcombine.high %v77_v51, %v77_v51  ;;  %v183_v60 = vsel %vm176_vm0, %v77_v51, %v121_v46  ;;  %v182_v61 = vsel %vm176_vm0, %v78_v48, %v122_v54  ;;  %v1178_v62 = vpack.c.bf16 %v1435_v3, %v190_v58  ;;  %v1402_v11 = vld [vmem:[%s1610_s5 + $0x30] sm:$0xff]  }
  0x38   :  { %v191_v63 = vsel %vm185_vm1, %v182_v61, %v158_v42  ;;  %v192_v0 = vsel %vm185_vm1, %v183_v60, %v167_v57 }
  0x39   :  { %1241 = vmatpush3.bf16.msra.mxu0 %v1367_v12  ;;  %v184_v35 = vsel %vm176_vm0, %v79_v56, %v123_v52  ;;  %v1175_v1 = vpack.c.bf16 %v1435_v3, %v191_v63  ;;  %v1184_v4 = vpack.c.bf16 %v1435_v3, %v192_v0  ;;  %v1403_v12 = vld [vmem:[%s1610_s5 + $0x38] sm:$0xff]  }
  0x3a   :  { %1263 = vmatpush3.bf16.msra.mxu1 %v1368_v13  ;;  %1242 = vmatprep.subr.bf16.mxu0 %v1369_v14  ;;  %v193_v2 = vsel %vm185_vm1, %v184_v35, %v165_v53 }
  0x3b   :  { %1264 = vmatprep.subr.bf16.mxu1 %v1370_v15  ;;  %v1181_v5 = vpack.c.bf16 %v1435_v3, %v193_v2  ;;  %1176 = vmatprep.mubr.msk.bf16.mxu0 %vm1505_vm4, %v1175_v1  ;;  %v1097_v15 = vld [vmem:[%s1609_s4] ss:$0 sm:$0xff] }
  0x3d   :  { %1243 = vmatpush3.bf16.msra.mxu0 %v1371_v16  ;;  %1182 = vmatprep.mubr.msk.bf16.mxu1 %vm1505_vm4, %v1181_v5 }
  0x3e   :  { %1265 = vmatpush3.bf16.msra.mxu1 %v1372_v17  ;;  %1244 = vmatprep.subr.bf16.mxu0 %v1373_v18 }
  0x3f   :  { %1266 = vmatprep.subr.bf16.mxu1 %v1374_v19 }
  0x41   :  { %1245 = vmatpush3.bf16.msra.mxu0 %v1375_v20 }
  0x42   :  { %1267 = vmatpush3.bf16.msra.mxu1 %v1376_v21  ;;  %1246 = vmatprep.subr.bf16.mxu0 %v1377_v22 }
  0x43   :  { %1268 = vmatprep.subr.bf16.mxu1 %v1378_v23 }
  0x45   :  { %1247 = vmatpush3.bf16.msra.mxu0 %v1379_v24 }
  0x46   :  { %1269 = vmatpush3.bf16.msra.mxu1 %v1380_v25  ;;  %1248 = vmatprep.subr.bf16.mxu0 %v1381_v26 }
  0x47   :  { %1270 = vmatprep.subr.bf16.mxu1 %v1382_v27 }
  0x49   :  { %1249 = vmatpush3.bf16.msra.mxu0 %v1383_v28 }
  0x4a   :  { %1271 = vmatpush3.bf16.msra.mxu1 %v1384_v29  ;;  %1250 = vmatprep.subr.bf16.mxu0 %v1385_v30 }
  0x4b   :  { %1272 = vmatprep.subr.bf16.mxu1 %v1386_v31 }
  0x4d   :  { %1251 = vmatpush3.bf16.msra.mxu0 %v1387_v32 }
  0x4e   :  { %1273 = vmatpush3.bf16.msra.mxu1 %v1388_v33  ;;  %1252 = vmatprep.subr.bf16.mxu0 %v1389_v34 }
  0x4f   :  { %1274 = vmatprep.subr.bf16.mxu1 %v1390_v36 }
  0x51   :  { %1253 = vmatpush3.bf16.msra.mxu0 %v1391_v43 }
  0x52   :  { %1275 = vmatpush3.bf16.msra.mxu1 %v1392_v44  ;;  %1293 = vmatprep.subr.bf16.mxu0 %v1435_v3 }
  0x53   :  { %1313 = vmatprep.subr.mxu1 %v1435_v3 }
  0x54   :  { %1179 = vmatmul.mubr.msk.bf16.vlgmr.msra.gmra.mrb[4].mxu0 %vm1505_vm4, %v1178_v62  ;;  %v1437_v62 = vmov 1.0  }
  0x55   :  { %1185 = vmatmul.mubr.msk.bf16.vlgmr.msra.gmra.mrb[4].mxu1 %vm1505_vm4, %v1184_v4  ;;  %1294 = vmatpush3.bf16.msra.mxu0 %v1396_v6 }
  0x56   :  { %1295 = vmatprep.subr.bf16.mxu0 %v1435_v3  ;;  %1309 = vmatprep.mubr.msk.bf16.mxu0 %vm1436_vm5, %v1435_v3 }
  0x57   :  { %1315 = vmatprep.mubr.msk.f32.mxu1 %vm1436_vm5, %v1435_v3 }
  0x59   :  { %1296 = vmatpush3.bf16.msra.mxu0 %v1397_v7 }
  0x5a   :  { %1297 = vmatprep.subr.bf16.mxu0 %v1435_v3 }
  0x5d   :  { %1298 = vmatpush3.bf16.msra.mxu0 %v1398_v8 }
  0x5e   :  { %1299 = vmatprep.subr.bf16.mxu0 %v1435_v3 }
  0x61   :  { %1300 = vmatpush3.bf16.msra.mxu0 %v1399_v59 }
  0x62   :  { %1301 = vmatprep.subr.bf16.mxu0 %v1435_v3 }
  0x65   :  { %1302 = vmatpush3.bf16.msra.mxu0 %v1400_v9 }
  0x66   :  { %1303 = vmatprep.subr.bf16.mxu0 %v1435_v3 }
  0x69   :  { %1304 = vmatpush3.bf16.msra.mxu0 %v1401_v10 }
  0x6a   :  { %1305 = vmatprep.subr.bf16.mxu0 %v1435_v3 }
  0x6d   :  { %1306 = vmatpush3.bf16.msra.mxu0 %v1402_v11 }
  0x6e   :  { %1307 = vmatprep.subr.bf16.mxu0 %v1435_v3 }
  0x71   :  { %1308 = vmatpush3.bf16.msra.mxu0 %v1403_v12 }
 0x107   :  { %v1210_v13 = vpop.f32.mrb[0].mxu0 }
 0x108   :  { %v1232_v14 = vpop.f32.mrb[0].mxu1  ;;  %v1211_v16 = vpop.f32.mrb[1].mxu0 }
 0x109   :  { %v1233_v17 = vpop.f32.mrb[1].mxu1  ;;  %v1212_v18 = vadd.f32 %v1211_v16, %v1210_v13  ;;  %v1213_v20 = vpop.f32.mrb[2].mxu0 }
 0x10a   :  { %v1234_v19 = vadd.f32 %v1233_v17, %v1232_v14  ;;  %v1235_v21 = vpop.f32.mrb[2].mxu1  ;;  %v1214_v22 = vpop.f32.mrb[3].mxu0 }
 0x10b   :  { %v1236_v23 = vpop.f32.mrb[3].mxu1  ;;  %v765_v24 = vadd.f32 %v1212_v18, %v1097_v15  ;;  %v1215_v25 = vadd.f32 %v1214_v22, %v1213_v20 }
 0x10c   :  { %v1237_v26 = vadd.f32 %v1236_v23, %v1235_v21 }
 0x10d   :  { %v806_v27 = vadd.f32 %v1234_v19, %v765_v24  ;;  %v768_v28 = vadd.f32 %v1215_v25, %v1097_v15 }
 0x10f   :  { %v809_v3 = vadd.f32 %v1237_v26, %v768_v28 }
 0x127   :  { %v1254_v29 = vpop.f32.mrb[4].mxu0 }
 0x128   :  { %v1276_v30 = vpop.f32.mrb[4].mxu1  ;;  %v1255_v31 = vpop.f32.mrb[5].mxu0 }
 0x129   :  { %v1256_v32 = vadd.f32 %v1255_v31, %v1254_v29  ;;  %v1277_v33 = vpop.f32.mrb[5].mxu1  ;;  %v1257_v34 = vpop.f32.mrb[6].mxu0 }
 0x12a   :  { %v1278_v36 = vadd.f32 %v1277_v33, %v1276_v30  ;;  %v1279_v37 = vpop.f32.mrb[6].mxu1  ;;  %v1258_v38 = vpop.f32.mrb[7].mxu0 }
 0x12b   :  { %v847_v39 = vadd.f32 %v1256_v32, %v806_v27  ;;  %v1259_v40 = vadd.f32 %v1258_v38, %v1257_v34  ;;  %v1280_v41 = vpop.f32.mrb[7].mxu1 }
 0x12c   :  { %v1281_v42 = vadd.f32 %v1280_v41, %v1279_v37 }
 0x12d   :  { %v888_v43 = vadd.f32 %v1278_v36, %v847_v39  ;;  %v850_v44 = vadd.f32 %v1259_v40, %v809_v3 }
 0x12f   :  { %v891_v45 = vadd.f32 %v1281_v42, %v850_v44  ;;  %v894_v46 = vmax.f32 %v888_v43, 0.0 }
 0x131   :  { %v895_v47 = vmax.f32 %v891_v45, 0.0 }
 0x133   :  { %v896_v48 = vpack.c.bf16 %v895_v47, %v894_v46 }
 0x135   :  { %1310 = vmatmul.mubr.bf16.vlgmr.msra.gmra.mrb[8].mxu0 %v896_v48 }
 0x208   :  { %v995_v49 = vpop.f32.mrb[8].mxu0 }
 0x209   :  { %v1002_v50 = vrot.slane %v995_v49, 2  ;;  %v1005_v51 = vrot.slane %v995_v49, 4  ;;  %v1311_v52 = vpop.f32.mrb[9].mxu0 }
 0x20a   :  { %v998_v53 = vpop.f32.mrb[10].mxu0 }
 0x20b   :  { %v1007_v54 = vsub.f32 %v995_v49, %v1005_v51  ;;  %v1312_v55 = vpop.f32.mrb[11].mxu0  ;;  %v1004_v56 = vsub.f32 %v995_v49, %v1002_v50 }
 0x20d   :  { %v1009_v57 = vrot.slane %v1007_v54, 6 }
 0x20f   :  { %v1011_v58 = vsel %vm176_vm0, %v1004_v56, %v1009_v57 }
 0x210   :  { %v1012_v60 = vsel %vm185_vm1, %v1011_v58, 0.0 }
 0x211   :  { %v1013_v61 = vmul.f32 %v1012_v60, %v1012_v60 }
 0x213   :  { %1314 = vmatpush3.xpose.msra.mxu1 %v1013_v61 }
 0x216   :  { %1316 = vmatmul.mubr.f32.vlgmr.msra.gmra.mrb[8].mxu1 %v1437_v62 }
 0x2e9   :  { %v1080_v63 = vpop.f32.mrb[8].mxu1 }
 0x2ea   :  { %1404 = vrsqrt.f32 %v1080_v63  ;;  %v1317_v35 = vpop.f32.mrb[9].mxu1  ;;  %vm1086_vm6 = vcmp.eq.f32.partialorder %v1080_v63, inf  ;;  %v1089_v2 = vand.u32 2147483648, %v1080_v63  ;;  %vm1088_vm7 = vcmp.eq.f32.partialorder %v1080_v63, 0.0 }
 0x2f4   :  { %v1405_v0 = vpop.eup %1404 }
 0x2f5   :  { %v1085_v1 = vmul.f32 %v1405_v0, %v1080_v63 }
 0x2f7   :  { %v1087_v4 = vsel %vm1086_vm6, %v1080_v63, %v1085_v1 }
 0x2f8   :  { %v1090_v5 = vsel %vm1088_vm7, %v1089_v2, %v1087_v4 }
 0x2f9   :  { %1091 = vst [vmem:[%s1611_s6] sm:$0x1] %v1090_v5 }
 0x2fa   :  { %1096 = vsyncpa [#allocation3], 1 }

</bundles_post_ra>
